<compile_context>
chip_gen: v7x
topology: tpu7x:2x2x1
jax: 0.10.0
libtpu: 0.0.40
codegen_flags: <defaults>
</compile_context>

<pallas_src>
import functools

import jax
import jax.numpy as jnp
from jax.experimental import pallas as pl
from jax.experimental.pallas import tpu as pltpu

KSIZE = 7
PAD = KSIZE // 2


# ----------------------------------------------------------------------------
# Constant builders (wrapper-side, plain JAX)
# ----------------------------------------------------------------------------
def _banded_conv_matrix(conv_weight, h, w, hw_p):
    """band[c, p, q] = weight[0, c, ky, kx] for the tap that maps input flat
    position p=(iy,ix) onto output flat position q=(oy,ox) (zero if out of the
    7x7 window / out of bounds / in the lane-padding region).  Then the "same"
    conv of the 2-channel [avg, max] map is  conv = avg @ band[0] + max @ band[1].
    """
    hw = h * w
    oy = jnp.arange(h).reshape(h, 1, 1, 1)
    ox = jnp.arange(w).reshape(1, w, 1, 1)
    iy = jnp.arange(h).reshape(1, 1, h, 1)
    ix = jnp.arange(w).reshape(1, 1, 1, w)
    dy = iy - oy
    dx = ix - ox
    valid = (jnp.abs(dy) <= PAD) & (jnp.abs(dx) <= PAD)          # (h, w, h, w)
    ky = jnp.clip(dy + PAD, 0, KSIZE - 1)
    kx = jnp.clip(dx + PAD, 0, KSIZE - 1)
    wq = conv_weight.reshape(2, KSIZE, KSIZE).astype(jnp.float32)
    vals = jnp.where(valid[None], wq[:, ky, kx], 0.0)            # (2, oy, ox, iy, ix)
    band = vals.transpose(0, 3, 4, 1, 2).reshape(2, hw, hw)      # (2, p, q)
    if hw_p != hw:
        band = jnp.pad(band, ((0, 0), (0, hw_p - hw), (0, hw_p - hw)))
    return band


def _weighted_pad_masks(conv_weight, h, w, hw_p):
    """Fallback constants for large maps: wm[c, t, p] = weight[0,c,ky,kx] *
    [tap t=(ky,kx) in-bounds at flat position p], padded with zeros to hw_p."""
    hw = h * w
    ii = jnp.arange(h)[:, None]
    jj = jnp.arange(w)[None, :]
    masks = []
    for ky in range(KSIZE):
        for kx in range(KSIZE):
            dy, dx = ky - PAD, kx - PAD
            m = ((ii + dy >= 0) & (ii + dy < h) &
                 (jj + dx >= 0) & (jj + dx < w))
            masks.append(m.reshape(-1))
    masks = jnp.stack(masks).astype(jnp.float32)                       # (49, hw)
    wflat = conv_weight.reshape(2, KSIZE * KSIZE).astype(jnp.float32)  # (2, 49)
    wm = wflat[:, :, None] * masks[None]                               # (2, 49, hw)
    if hw_p != hw:
        wm = jnp.pad(wm, ((0, 0), (0, 0), (0, hw_p - hw)))
    return wm


# ----------------------------------------------------------------------------
# Kernels
# ----------------------------------------------------------------------------
def _chunk_loop(nb, chunk, process):
    """Run `process(start_image)` over the block in sublane-sized chunks."""
    trips = nb // chunk
    if trips == 1:
        process(0)
    else:
        def body(ci, carry):
            process(pl.multiple_of(ci * chunk, chunk))
            return carry
        jax.lax.fori_loop(0, trips, body, 0, unroll=(trips <= 8))


def _spatial_attention_mxu_kernel(w0_ref, w1_ref, x_ref, o_ref, *, chunk):
    # w0_ref/w1_ref: (HWp, HWp) f32 banded conv weights (grid-invariant, VMEM-resident)
    # x_ref / o_ref: (Nb, C, HWp) input/output block (lane dim = HWp, dense)
    nb = x_ref.shape[0]
    w0 = w0_ref[...]
    w1 = w1_ref[...]

    def process(i0):
        sl = pl.ds(i0, chunk)
        xch = x_ref[sl]                                   # (chunk, C, HWp), native dtype
        xf = xch.astype(jnp.float32)
        avg = jnp.mean(xf, axis=1)                        # (chunk, HWp) f32
        mxv = jnp.max(xf, axis=1)                         # (chunk, HWp) f32
        conv = (jnp.dot(avg, w0, preferred_element_type=jnp.float32)
                + jnp.dot(mxv, w1, preferred_element_type=jnp.float32))
        attn = jax.nn.sigmoid(conv)                       # (chunk, HWp) f32
        o_ref[sl] = (xch * attn[:, None, :].astype(xch.dtype)).astype(o_ref.dtype)

    _chunk_loop(nb, chunk, process)


def _spatial_attention_roll_kernel(wm_ref, x_ref, o_ref, *, width, chunk):
    # Fallback for large H*W: 7x7 conv as weighted zero-pad-masked lane rolls.
    nb = x_ref.shape[0]
    hw = x_ref.shape[2]

    def process(i0):
        sl = pl.ds(i0, chunk)
        xch = x_ref[sl]
        xf = xch.astype(jnp.float32)
        avg = jnp.mean(xf, axis=1)
        mxv = jnp.max(xf, axis=1)
        acc0 = jnp.zeros_like(avg)       # two accumulators -> break the serial
        acc1 = jnp.zeros_like(avg)       # VALU dependence chain
        for ky in range(KSIZE):
            for kx in range(KSIZE):
                t = ky * KSIZE + kx
                s = (ky - PAD) * width + (kx - PAD)
                sh = (-s) % hw
                ra = pltpu.roll(avg, sh, axis=1) if sh else avg
                rm = pltpu.roll(mxv, sh, axis=1) if sh else mxv
                acc0 = acc0 + wm_ref[0, t][None, :] * ra
                acc1 = acc1 + wm_ref[1, t][None, :] * rm
        attn = jax.nn.sigmoid(acc0 + acc1)
        o_ref[sl] = (xch * attn[:, None, :].astype(xch.dtype)).astype(o_ref.dtype)

    _chunk_loop(nb, chunk, process)


# ----------------------------------------------------------------------------
# Block / chunk sizing
# ----------------------------------------------------------------------------
def _pick_batch_block(n, bytes_per_image, target_bytes):
    """Images per grid step: fill sublanes (>=8) when images are small, grow
    toward target_bytes, keep >=2 grid steps (v7x megacore) when N allows."""
    nb = max(1, target_bytes // max(1, bytes_per_image))
    if 8 * bytes_per_image <= 4 * target_bytes:     # sublane floor unless images are huge
        nb = max(nb, 8)
    nb = min(n, nb)
    if n // nb < 2 and n >= 16:                      # give v7x's second TensorCore work
        nb = n // 2
    while n % nb:
        nb -= 1
    return max(nb, 1)


def _pick_chunk(nb, c, hw_p):
    """Images per in-kernel chunk: bound the per-chunk f32 live set (~64 vregs)."""
    chunk = max(1, min(nb, 8, (256 * 1024) // max(1, c * hw_p * 4)))
    while nb % chunk:
        chunk -= 1
    return chunk


# ----------------------------------------------------------------------------
# Wrapper
# ----------------------------------------------------------------------------
def spatial_attention(x, conv_weight, *, target_block_bytes=2 << 20):
    """x: (N, C, H, W); conv_weight: (1, 2, K, K) (PyTorch Conv2d(2,1,7,bias=False))."""
    n, c, h, w = x.shape
    hw = h * w
    hw_p = ((hw + 127) // 128) * 128                 # lane-dense spatial dim

    x_flat = x.reshape(n, c, hw)
    if hw_p != hw:
        x_flat = jnp.pad(x_flat, ((0, 0), (0, 0), (0, hw_p - hw)))

    nb = _pick_batch_block(n, c * hw_p * x.dtype.itemsize, target_block_bytes)
    chunk = _pick_chunk(nb, c, hw_p)

    # MXU path when the banded weight matrices fit comfortably in VMEM.
    use_mxu = 2 * hw_p * hw_p * 4 <= (8 << 20)       # up to ~32x32 maps

    if use_mxu:
        band = _banded_conv_matrix(conv_weight, h, w, hw_p)      # (2, HWp, HWp) f32
        consts = (band[0], band[1])
        const_specs = [pl.BlockSpec((hw_p, hw_p), lambda i: (0, 0)),
                       pl.BlockSpec((hw_p, hw_p), lambda i: (0, 0))]
        kernel = functools.partial(_spatial_attention_mxu_kernel, chunk=chunk)
        const_bytes = 2 * hw_p * hw_p * 4
    else:
        wm = _weighted_pad_masks(conv_weight, h, w, hw_p)        # (2, 49, HWp) f32
        consts = (wm,)
        const_specs = [pl.BlockSpec((2, KSIZE * KSIZE, hw_p), lambda i: (0, 0, 0))]
        kernel = functools.partial(_spatial_attention_roll_kernel, width=w, chunk=chunk)
        const_bytes = 2 * KSIZE * KSIZE * hw_p * 4

    # Rough double-buffered VMEM estimate; only raise the scoped limit if needed.
    c_pad = ((c + 7) // 8) * 8
    block_bytes = nb * c_pad * hw_p * x.dtype.itemsize
    vmem_est = 4 * block_bytes + 2 * const_bytes + (2 << 20)
    cp_kwargs = dict(dimension_semantics=("parallel",))          # batch steps independent
    if vmem_est > (12 << 20):
        cp_kwargs["vmem_limit_bytes"] = int(vmem_est)

    out = pl.pallas_call(
        kernel,
        out_shape=jax.ShapeDtypeStruct((n, c, hw_p), x.dtype),
        grid_spec=pltpu.PrefetchScalarGridSpec(
            num_scalar_prefetch=0,
            grid=(n // nb,),
            in_specs=const_specs + [pl.BlockSpec((nb, c, hw_p), lambda i: (i, 0, 0))],
            out_specs=pl.BlockSpec((nb, c, hw_p), lambda i: (i, 0, 0)),
        ),
        compiler_params=pltpu.CompilerParams(**cp_kwargs),
    )(*consts, x_flat)

    if hw_p != hw:
        out = out[:, :, :hw]
    return out.reshape(n, c, h, w)


# ----------------------------------------------------------------------------
# Test
# ----------------------------------------------------------------------------
if __name__ == "__main__":
    key = jax.random.PRNGKey(0)
    kx, kw = jax.random.split(key)

    N, C, H, W = 2, 4, 16, 16
    x = jax.random.normal(kx, (N, C, H, W), dtype=jnp.float32)

    # Deterministic Conv2d(2, 1, 7, bias=False) weight (kaiming-uniform-like bound).
    fan_in = 2 * KSIZE * KSIZE
    bound = 1.0 / (fan_in ** 0.5)
    conv_weight = jax.random.uniform(kw, (1, 2, KSIZE, KSIZE),
                                     minval=-bound, maxval=bound, dtype=jnp.float32)

    out = jax.block_until_ready(spatial_attention(x, conv_weight))

    # Pure-JAX reference (same semantics as the PyTorch module).
    avg = jnp.mean(x, axis=1, keepdims=True)
    mx = jnp.max(x, axis=1, keepdims=True)
    att_in = jnp.concatenate([avg, mx], axis=1)
    conv = jax.lax.conv_general_dilated(
        att_in, conv_weight, window_strides=(1, 1), padding="SAME",
        dimension_numbers=("NCHW", "OIHW", "NCHW"))
    ref = x * jax.nn.sigmoid(conv)

    assert out.shape == ref.shape and out.dtype == ref.dtype
    err = float(jnp.max(jnp.abs(out - ref)))
    assert jnp.allclose(out, ref, atol=5e-5, rtol=5e-5), err
    print("KERNEL_OK")
</pallas_src>

<mosaic_0001>
module attributes {stable_mosaic.version = 11 : i64} {
  func.func @_spatial_attention_mxu_kernel(%arg0: i32, %arg1: memref<256x256xf32, #tpu.memory_space<vmem>>, %arg2: memref<256x256xf32, #tpu.memory_space<vmem>>, %arg3: memref<2x4x256xf32, #tpu.memory_space<vmem>>, %arg4: memref<2x4x256xf32, #tpu.memory_space<vmem>>) attributes {dimension_semantics = [#tpu.dimension_semantics<parallel>], iteration_bounds = array<i64: 1>, scalar_prefetch = 0 : i64, scratch_operands = 0 : i64, tpu.core_type = #tpu.core_type<tc>, window_params = [{pipeline_mode = #tpu.pipeline_mode<synchronous>, transform_indices = @transform_0, window_bounds = array<i64: 256, 256>}, {pipeline_mode = #tpu.pipeline_mode<synchronous>, transform_indices = @transform_1, window_bounds = array<i64: 256, 256>}, {transform_indices = @transform_2, window_bounds = array<i64: 2, 4, 256>}, {transform_indices = @transform_3, window_bounds = array<i64: 2, 4, 256>}]} {
    %c0 = arith.constant 0 : index
    %c0_0 = arith.constant 0 : index
    %0 = vector.load %arg1[%c0, %c0_0] : memref<256x256xf32, #tpu.memory_space<vmem>>, vector<256x256xf32>
    %c0_1 = arith.constant 0 : index
    %c0_2 = arith.constant 0 : index
    %1 = vector.load %arg2[%c0_1, %c0_2] : memref<256x256xf32, #tpu.memory_space<vmem>>, vector<256x256xf32>
    %c0_3 = arith.constant 0 : index
    %c0_4 = arith.constant 0 : index
    %c0_5 = arith.constant 0 : index
    %2 = vector.load %arg3[%c0_3, %c0_4, %c0_5] : memref<2x4x256xf32, #tpu.memory_space<vmem>>, vector<2x4x256xf32>
    %cst = arith.constant dense<0.000000e+00> : vector<2x256xf32>
    %3 = vector.multi_reduction <add>, %2, %cst [1] : vector<2x4x256xf32> to vector<2x256xf32>
    %cst_6 = arith.constant 4.000000e+00 : f32
    %4 = vector.broadcast %cst_6 : f32 to vector<2x256xf32>
    %5 = arith.divf %3, %4 : vector<2x256xf32>
    %cst_7 = arith.constant dense<0xFF800000> : vector<2x256xf32>
    %6 = vector.multi_reduction <maximumf>, %2, %cst_7 [1] : vector<2x4x256xf32> to vector<2x256xf32>
    %cst_8 = arith.constant dense<0.000000e+00> : vector<2x256xf32>
    %7 = tpu.matmul %5, %0, %cst_8 {dimension_numbers = #tpu.dot_dimension_numbers<[1], [0], [0], [1], [0, 0, 1, 1], [], []>} : vector<2x256xf32>, vector<256x256xf32>, vector<2x256xf32> -> vector<2x256xf32>
    %cst_9 = arith.constant dense<0.000000e+00> : vector<2x256xf32>
    %8 = tpu.matmul %6, %1, %cst_9 {dimension_numbers = #tpu.dot_dimension_numbers<[1], [0], [0], [1], [0, 0, 1, 1], [], []>} : vector<2x256xf32>, vector<256x256xf32>, vector<2x256xf32> -> vector<2x256xf32>
    %9 = arith.addf %7, %8 : vector<2x256xf32>
    %10 = arith.negf %9 : vector<2x256xf32>
    %11 = math.exp %10 : vector<2x256xf32>
    %cst_10 = arith.constant 1.000000e+00 : f32
    %12 = vector.broadcast %cst_10 : f32 to vector<2x256xf32>
    %13 = arith.addf %12, %11 : vector<2x256xf32>
    %14 = arith.divf %12, %13 : vector<2x256xf32>
    %15 = vector.shape_cast %14 : vector<2x256xf32> to vector<2x1x256xf32>
    %16 = vector.broadcast %15 : vector<2x1x256xf32> to vector<2x4x256xf32>
    %17 = arith.mulf %2, %16 : vector<2x4x256xf32>
    %c0_11 = arith.constant 0 : index
    %c0_12 = arith.constant 0 : index
    %c0_13 = arith.constant 0 : index
    %18 = vector.load %arg4[%c0_11, %c0_12, %c0_13] : memref<2x4x256xf32, #tpu.memory_space<vmem>>, vector<2x4x256xf32>
    tpu.vector_store %arg4[%c0_11, %c0_12, %c0_13], %17 {strides = array<i32>} : memref<2x4x256xf32, #tpu.memory_space<vmem>>, vector<2x4x256xf32>,
    return
  }
  func.func @transform_0(%arg0: i32) -> (i32, i32) {
    %c0_i32 = arith.constant 0 : i32
    %c0_i32_0 = arith.constant 0 : i32
    %c0_i32_1 = arith.constant 0 : i32
    return %c0_i32, %c0_i32_0 : i32, i32
  }
  func.func @transform_1(%arg0: i32) -> (i32, i32) {
    %c0_i32 = arith.constant 0 : i32
    %c0_i32_0 = arith.constant 0 : i32
    %c0_i32_1 = arith.constant 0 : i32
    return %c0_i32, %c0_i32_0 : i32, i32
  }
  func.func @transform_2(%arg0: i32) -> (i32, i32, i32) {
    %c0_i32 = arith.constant 0 : i32
    %c0_i32_0 = arith.constant 0 : i32
    %c0_i32_1 = arith.constant 0 : i32
    return %arg0, %c0_i32, %c0_i32_0 : i32, i32, i32
  }
  func.func @transform_3(%arg0: i32) -> (i32, i32, i32) {
    %c0_i32 = arith.constant 0 : i32
    %c0_i32_0 = arith.constant 0 : i32
    %c0_i32_1 = arith.constant 0 : i32
    return %arg0, %c0_i32, %c0_i32_0 : i32, i32, i32
  }
}

</mosaic_0001>

<bundles_post_ra>
// kernel: tpu_custom_call.1
= control target key start
LH: loop header
LB: loop body
LE: loop exit
PB: predicated region body
PF: predicated region fallthrough
CT: control target
= control target key end

     0   :  { %8 = vsyncpa [#allocation3], 0  ;;  %s985_s0 = inlined_call_operand.hbm [shape: f32[256,256], index: 0, kind: input, shape index: {}]   ;;  %s986_s1 = inlined_call_operand.hbm [shape: f32[256,256], index: 1, kind: input, shape index: {}]   ;;  %s987_s2 = inlined_call_operand.hbm [shape: f32[2,4,256], index: 2, kind: input, shape index: {}]   ;;  %s988_s3 = inlined_call_operand.hbm [shape: f32[2,4,256], index: 3, kind: output, shape index: {}]  }
   0x1   :  { %9 = vsyncpa [#allocation6], 0 }
   0x2   :  { %10 = vsyncpa [#allocation4], 0  ;;  %s737_s12 = smov [#allocation5]   ;;  %s738_s14 = smov [#allocation2]  }
   0x3   :  { %s28_s13 = sshll.u32 %s737_s12, 4  ;;  %s16_s15 = sshll.u32 %s738_s14, 4  ;;  %s29_s13 = int_to_ptr.vmem [resolvable:$true] %s28_s13  ;;  %s766_s15 = int_to_ptr.vmem [resolvable:$true] %s16_s15 }
   0x4   :  { %s643_s18 = scalar_lea.hbm %s986_s1, 8192 }
   0x5   :  { %p644_p0 = scmp.ne.s32.totalorder %s986_s1, %s643_s18  ;;  %p647_p1 = scmp.lt.u32.totalorder %s643_s18, %s986_s1 }
   0x7   :  { %p649_p2 = pnand %p647_p1, %p644_p0 }
   0x9   :  { %652 = shalt.err (!%p649_p2)
}
   0xa   :  { %s653_s23 = scalar_lea.vmem %s29_s13, 8192  ;;  %p658_p4 = scmp.lt.s32.totalorder %s29_s13, %s29_s13 }
   0xb   :  { %p654_p3 = scmp.ne.s32.totalorder %s29_s13, %s653_s23  ;;  %p659_p5 = scmp.lt.s32.totalorder %s653_s23, %s653_s23 }
   0xd   :  { %p660_p6 = por %p659_p5, %p658_p4 }
   0xf   :  { %p661_p7 = pnand %p660_p6, %p654_p3 }
  0x11   :  { %664 = shalt.err (!%p661_p7)
}
  0x12   :  { %s739_s24 = smov 256   ;;  %s740_s25 = smov 16  }
  0x13   :  { %34 = dma.hbm_to_vmem [thread:$0]  %s986_s1, 8192, %s29_s13, [#allocation6], %s739_s24, %s739_s24, %s740_s25  }
  0x14   :  { %s665_s30 = scalar_lea.hbm %s985_s0, 8192 }
  0x15   :  { %p666_p8 = scmp.ne.s32.totalorder %s985_s0, %s665_s30  ;;  %p669_p9 = scmp.lt.u32.totalorder %s665_s30, %s985_s0 }
  0x17   :  { %p671_p10 = pnand %p669_p9, %p666_p8 }
  0x19   :  { %674 = shalt.err (!%p671_p10)
}
  0x1a   :  { %s675_s8 = scalar_lea.vmem %s766_s15, 8192  ;;  %p680_p12 = scmp.lt.s32.totalorder %s766_s15, %s766_s15 }
  0x1b   :  { %p676_p11 = scmp.ne.s32.totalorder %s766_s15, %s675_s8  ;;  %p681_p13 = scmp.lt.s32.totalorder %s675_s8, %s675_s8 }
  0x1d   :  { %p682_p0 = por %p681_p13, %p680_p12 }
  0x1f   :  { %p683_p1 = pnand %p682_p0, %p676_p11 }
  0x21   :  { %686 = shalt.err (!%p683_p1)
}
  0x22   :  { %22 = dma.hbm_to_vmem [thread:$0]  %s985_s0, 8192, %s766_s15, [#allocation3], %s739_s24, %s739_s24, %s740_s25  }
  0x23   :  { %s741_s10 = smov [#allocation7]   ;;  %s687_s14 = scalar_lea.hbm %s987_s2, 256 }
  0x24   :  { %s40_s11 = sshll.u32 %s741_s10, 4  ;;  %p688_p2 = scmp.ne.s32.totalorder %s987_s2, %s687_s14  ;;  %s41_s11 = int_to_ptr.vmem [resolvable:$true] %s40_s11 }
  0x25   :  { %p691_p3 = scmp.lt.u32.totalorder %s687_s14, %s987_s2 }
  0x27   :  { %p693_p4 = pnand %p691_p3, %p688_p2 }
  0x29   :  { %696 = shalt.err (!%p693_p4)
}
  0x2a   :  { %s697_s20 = scalar_lea.vmem %s41_s11, 256  ;;  %p702_p6 = scmp.lt.s32.totalorder %s41_s11, %s41_s11 }
  0x2b   :  { %p698_p5 = scmp.ne.s32.totalorder %s41_s11, %s697_s20  ;;  %p703_p7 = scmp.lt.s32.totalorder %s697_s20, %s697_s20 }
  0x2d   :  { %p704_p8 = por %p703_p7, %p702_p6 }
  0x2f   :  { %p705_p9 = pnand %p704_p8, %p698_p5 }
  0x31   :  { %708 = shalt.err (!%p705_p9)
}
  0x32   :  { %s742_s0 = smov 128   ;;  %s743_s15 = smov 8  }
  0x33   :  { %46 = dma.hbm_to_vmem [thread:$0]  %s987_s2, 256, %s41_s11, [#allocation6], %s742_s0, %s742_s0, %s743_s15  }
  0x34   :  { %731 = dma.done.wait [#allocation3], 8192  }
  0x35   :  { %732 = vsyncadd [#allocation3], 4294959104 }
  0x36   :  { %733 = dma.done.wait [#allocation6], 8448  }
  0x37   :  { %734 = vsyncadd [#allocation6], 4294958848  ;;  %v121_v0 = vld [vmem:[#allocation5 + $0x8] sm:$0xff]  ;;  %v123_v1 = vld [vmem:[#allocation5 + $0x18] sm:$0xff]  ;;  %vm192_vm0 = vcmask 1043456   ;;  %vm258_vm1 = vcmask 1041409  }
  0x38   :  { %v57_v2 = vld [vmem:[#allocation2 + $0x8] sm:$0xff]  ;;  %v494_v3 = vpack.c.bf16 %v123_v1, %v121_v0  ;;  %v59_v4 = vld [vmem:[#allocation2 + $0x18] sm:$0xff]  ;;  %v120_v5 = vld [vmem:[#allocation5] sm:$0xff]  ;;  %s745_s2 = smov [#allocation8]  }
  0x39   :  { %v122_v6 = vld [vmem:[#allocation5 + $0x10] sm:$0xff]  ;;  %v558_v7 = vpack.c.bf16 %v59_v4, %v57_v2  ;;  %v56_v9 = vld [vmem:[#allocation2] sm:$0xff]  ;;  %v125_v11 = vld [vmem:[#allocation5 + $0x28] sm:$0xff]  ;;  %s479_s23 = sshll.u32 %s745_s2, 4  ;;  %s480_s23 = int_to_ptr.vmem [resolvable:$true] %s479_s23 }
  0x3a   :  { %v496_v8 = vpack.c.bf16 %v122_v6, %v120_v5  ;;  %v58_v10 = vld [vmem:[#allocation2 + $0x10] sm:$0xff]  ;;  %495 = vmatprep.subr.bf16.mxu1 %v494_v3  ;;  %v127_v13 = vld [vmem:[#allocation5 + $0x38] sm:$0xff]  ;;  %v61_v14 = vld [vmem:[#allocation2 + $0x28] sm:$0xff]  ;;  %s709_s24 = scalar_lea.vmem %s480_s23, 256  ;;  %p714_p11 = scmp.lt.s32.totalorder %s480_s23, %s480_s23 }
  0x3b   :  { %v560_v12 = vpack.c.bf16 %v58_v10, %v56_v9  ;;  %v63_v15 = vld [vmem:[#allocation2 + $0x38] sm:$0xff]  ;;  %559 = vmatprep.subr.bf16.mxu0 %v558_v7  ;;  %v498_v16 = vpack.c.bf16 %v127_v13, %v125_v11  ;;  %v124_v18 = vld [vmem:[#allocation5 + $0x20] sm:$0xff]  ;;  %v126_v19 = vld [vmem:[#allocation5 + $0x30] sm:$0xff]  ;;  %p710_p10 = scmp.ne.s32.totalorder %s480_s23, %s709_s24  ;;  %p715_p12 = scmp.lt.s32.totalorder %s709_s24, %s709_s24 }
  0x3c   :  { %497 = vmatpush1.bf16.msra.mxu1 %v496_v8  ;;  %v562_v17 = vpack.c.bf16 %v63_v15, %v61_v14  ;;  %v60_v20 = vld [vmem:[#allocation2 + $0x20] sm:$0xff]  ;;  %v500_v21 = vpack.c.bf16 %v126_v19, %v124_v18  ;;  %v62_v22 = vld [vmem:[#allocation2 + $0x30] sm:$0xff]  ;;  %v129_v23 = vld [vmem:[#allocation5 + $0x48] sm:$0xff] }
  0x3d   :  { %561 = vmatpush1.bf16.msra.mxu0 %v560_v12  ;;  %v131_v24 = vld [vmem:[#allocation5 + $0x58] sm:$0xff]  ;;  %499 = vmatprep.subr.bf16.mxu1 %v498_v16  ;;  %v564_v25 = vpack.c.bf16 %v62_v22, %v60_v20  ;;  %v65_v27 = vld [vmem:[#allocation2 + $0x48] sm:$0xff]  ;;  %v128_v29 = vld [vmem:[#allocation5 + $0x40] sm:$0xff]  ;;  %p716_p13 = por %p715_p12, %p714_p11 }
  0x3e   :  { %563 = vmatprep.subr.bf16.mxu0 %v562_v17  ;;  %v502_v26 = vpack.c.bf16 %v131_v24, %v129_v23  ;;  %v67_v28 = vld [vmem:[#allocation2 + $0x58] sm:$0xff]  ;;  %v130_v31 = vld [vmem:[#allocation5 + $0x50] sm:$0xff]  ;;  %v64_v32 = vld [vmem:[#allocation2 + $0x40] sm:$0xff] }
  0x3f   :  { %v566_v30 = vpack.c.bf16 %v67_v28, %v65_v27  ;;  %v66_v33 = vld [vmem:[#allocation2 + $0x50] sm:$0xff]  ;;  %v504_v34 = vpack.c.bf16 %v130_v31, %v128_v29  ;;  %v133_v35 = vld [vmem:[#allocation5 + $0x68] sm:$0xff]  ;;  %v135_v36 = vld [vmem:[#allocation5 + $0x78] sm:$0xff]  ;;  %p717_p0 = pnand %p716_p13, %p710_p10 }
  0x40   :  { %501 = vmatpush1.bf16.msra.mxu1 %v500_v21  ;;  %v69_v37 = vld [vmem:[#allocation2 + $0x68] sm:$0xff]  ;;  %v568_v38 = vpack.c.bf16 %v66_v33, %v64_v32  ;;  %v506_v39 = vpack.c.bf16 %v135_v36, %v133_v35  ;;  %v71_v40 = vld [vmem:[#allocation2 + $0x78] sm:$0xff]  ;;  %v132_v41 = vld [vmem:[#allocation5 + $0x60] sm:$0xff] }
  0x41   :  { %565 = vmatpush1.bf16.msra.mxu0 %v564_v25  ;;  %503 = vmatprep.subr.bf16.mxu1 %v502_v26  ;;  %v134_v42 = vld [vmem:[#allocation5 + $0x70] sm:$0xff]  ;;  %v570_v43 = vpack.c.bf16 %v71_v40, %v69_v37  ;;  %v68_v44 = vld [vmem:[#allocation2 + $0x60] sm:$0xff]  ;;  %v137_v46 = vld [vmem:[#allocation5 + $0x88] sm:$0xff] }
  0x42   :  { %567 = vmatprep.subr.bf16.mxu0 %v566_v30  ;;  %v70_v45 = vld [vmem:[#allocation2 + $0x70] sm:$0xff]  ;;  %v139_v47 = vld [vmem:[#allocation5 + $0x98] sm:$0xff]  ;;  %v73_v48 = vld [vmem:[#allocation2 + $0x88] sm:$0xff]  ;;  %v508_v50 = vpack.c.bf16 %v134_v42, %v132_v41 }
  0x43   :  { %v75_v49 = vld [vmem:[#allocation2 + $0x98] sm:$0xff]  ;;  %v572_v51 = vpack.c.bf16 %v70_v45, %v68_v44  ;;  %v510_v52 = vpack.c.bf16 %v139_v47, %v137_v46  ;;  %v136_v53 = vld [vmem:[#allocation5 + $0x80] sm:$0xff]  ;;  %v138_v54 = vld [vmem:[#allocation5 + $0x90] sm:$0xff] }
  0x44   :  { %505 = vmatpush1.bf16.msra.mxu1 %v504_v34  ;;  %v72_v55 = vld [vmem:[#allocation2 + $0x80] sm:$0xff]  ;;  %v574_v56 = vpack.c.bf16 %v75_v49, %v73_v48  ;;  %v74_v57 = vld [vmem:[#allocation2 + $0x90] sm:$0xff]  ;;  %v141_v58 = vld [vmem:[#allocation5 + $0xa8] sm:$0xff]  ;;  %v512_v62 = vpack.c.bf16 %v138_v54, %v136_v53 }
  0x45   :  { %569 = vmatpush1.bf16.msra.mxu0 %v568_v38  ;;  %507 = vmatprep.subr.bf16.mxu1 %v506_v39  ;;  %v143_v59 = vld [vmem:[#allocation5 + $0xb8] sm:$0xff]  ;;  %v77_v60 = vld [vmem:[#allocation2 + $0xa8] sm:$0xff]  ;;  %v576_v63 = vpack.c.bf16 %v74_v57, %v72_v55  ;;  %v140_v1 = vld [vmem:[#allocation5 + $0xa0] sm:$0xff] }
  0x46   :  { %571 = vmatprep.subr.bf16.mxu0 %v570_v43  ;;  %v79_v61 = vld [vmem:[#allocation2 + $0xb8] sm:$0xff]  ;;  %v514_v0 = vpack.c.bf16 %v143_v59, %v141_v58  ;;  %v142_v2 = vld [vmem:[#allocation5 + $0xb0] sm:$0xff]  ;;  %v76_v3 = vld [vmem:[#allocation2 + $0xa0] sm:$0xff] }
  0x47   :  { %v578_v4 = vpack.c.bf16 %v79_v61, %v77_v60  ;;  %v78_v5 = vld [vmem:[#allocation2 + $0xb0] sm:$0xff]  ;;  %v145_v6 = vld [vmem:[#allocation5 + $0xc8] sm:$0xff]  ;;  %v147_v7 = vld [vmem:[#allocation5 + $0xd8] sm:$0xff]  ;;  %v516_v10 = vpack.c.bf16 %v142_v2, %v140_v1 }
  0x48   :  { %509 = vmatpush1.bf16.msra.mxu1 %v508_v50  ;;  %v81_v8 = vld [vmem:[#allocation2 + $0xc8] sm:$0xff]  ;;  %v83_v9 = vld [vmem:[#allocation2 + $0xd8] sm:$0xff]  ;;  %v580_v11 = vpack.c.bf16 %v78_v5, %v76_v3  ;;  %v518_v12 = vpack.c.bf16 %v147_v7, %v145_v6  ;;  %v144_v13 = vld [vmem:[#allocation5 + $0xc0] sm:$0xff] }
  0x49   :  { %573 = vmatpush1.bf16.msra.mxu0 %v572_v51  ;;  %511 = vmatprep.subr.bf16.mxu1 %v510_v52  ;;  %v146_v14 = vld [vmem:[#allocation5 + $0xd0] sm:$0xff]  ;;  %v80_v15 = vld [vmem:[#allocation2 + $0xc0] sm:$0xff]  ;;  %v582_v16 = vpack.c.bf16 %v83_v9, %v81_v8  ;;  %v149_v18 = vld [vmem:[#allocation5 + $0xe8] sm:$0xff] }
  0x4a   :  { %575 = vmatprep.subr.bf16.mxu0 %v574_v56  ;;  %v82_v17 = vld [vmem:[#allocation2 + $0xd0] sm:$0xff]  ;;  %v151_v19 = vld [vmem:[#allocation5 + $0xf8] sm:$0xff]  ;;  %v85_v20 = vld [vmem:[#allocation2 + $0xe8] sm:$0xff]  ;;  %v520_v22 = vpack.c.bf16 %v146_v14, %v144_v13 }
  0x4b   :  { %v87_v21 = vld [vmem:[#allocation2 + $0xf8] sm:$0xff]  ;;  %v584_v23 = vpack.c.bf16 %v82_v17, %v80_v15  ;;  %v522_v24 = vpack.c.bf16 %v151_v19, %v149_v18  ;;  %v148_v25 = vld [vmem:[#allocation5 + $0xe0] sm:$0xff]  ;;  %v150_v26 = vld [vmem:[#allocation5 + $0xf0] sm:$0xff] }
  0x4c   :  { %513 = vmatpush1.bf16.msra.mxu1 %v512_v62  ;;  %v84_v27 = vld [vmem:[#allocation2 + $0xe0] sm:$0xff]  ;;  %v586_v28 = vpack.c.bf16 %v87_v21, %v85_v20  ;;  %v86_v29 = vld [vmem:[#allocation2 + $0xf0] sm:$0xff]  ;;  %v153_v30 = vld [vmem:[#allocation5 + $0x108] sm:$0xff]  ;;  %v524_v34 = vpack.c.bf16 %v150_v26, %v148_v25 }
  0x4d   :  { %577 = vmatpush1.bf16.msra.mxu0 %v576_v63  ;;  %515 = vmatprep.subr.bf16.mxu1 %v514_v0  ;;  %v155_v31 = vld [vmem:[#allocation5 + $0x118] sm:$0xff]  ;;  %v89_v32 = vld [vmem:[#allocation2 + $0x108] sm:$0xff]  ;;  %v152_v35 = vld [vmem:[#allocation5 + $0x100] sm:$0xff]  ;;  %v588_v36 = vpack.c.bf16 %v86_v29, %v84_v27 }
  0x4e   :  { %579 = vmatprep.subr.bf16.mxu0 %v578_v4  ;;  %v91_v33 = vld [vmem:[#allocation2 + $0x118] sm:$0xff]  ;;  %v526_v37 = vpack.c.bf16 %v155_v31, %v153_v30  ;;  %v154_v38 = vld [vmem:[#allocation5 + $0x110] sm:$0xff]  ;;  %v88_v39 = vld [vmem:[#allocation2 + $0x100] sm:$0xff] }
  0x4f   :  { %v90_v40 = vld [vmem:[#allocation2 + $0x110] sm:$0xff]  ;;  %v590_v41 = vpack.c.bf16 %v91_v33, %v89_v32  ;;  %v157_v42 = vld [vmem:[#allocation5 + $0x128] sm:$0xff]  ;;  %v159_v43 = vld [vmem:[#allocation5 + $0x138] sm:$0xff]  ;;  %v528_v48 = vpack.c.bf16 %v154_v38, %v152_v35 }
  0x50   :  { %517 = vmatpush1.bf16.msra.mxu1 %v516_v10  ;;  %v93_v44 = vld [vmem:[#allocation2 + $0x128] sm:$0xff]  ;;  %v95_v45 = vld [vmem:[#allocation2 + $0x138] sm:$0xff]  ;;  %v156_v46 = vld [vmem:[#allocation5 + $0x120] sm:$0xff]  ;;  %v592_v53 = vpack.c.bf16 %v90_v40, %v88_v39  ;;  %v530_v54 = vpack.c.bf16 %v159_v43, %v157_v42 }
  0x51   :  { %581 = vmatpush1.bf16.msra.mxu0 %v580_v11  ;;  %519 = vmatprep.subr.bf16.mxu1 %v518_v12  ;;  %v158_v47 = vld [vmem:[#allocation5 + $0x130] sm:$0xff]  ;;  %v812_v49 = vld [vmem:[#allocation2 + $0x120] sm:$0xff]  ;;  %v816_v51 = vld [vmem:[#allocation5 + $0x148] sm:$0xff]  ;;  %v594_v59 = vpack.c.bf16 %v95_v45, %v93_v44 }
  0x52   :  { %583 = vmatprep.subr.bf16.mxu0 %v582_v16  ;;  %v814_v50 = vld [vmem:[#allocation2 + $0x130] sm:$0xff]  ;;  %v818_v52 = vld [vmem:[#allocation5 + $0x158] sm:$0xff]  ;;  %v97_v55 = vld [vmem:[#allocation2 + $0x148] sm:$0xff]  ;;  %v532_v12 = vpack.c.bf16 %v158_v47, %v156_v46 }
  0x53   :  { %v99_v56 = vld [vmem:[#allocation2 + $0x158] sm:$0xff]  ;;  %v820_v57 = vld [vmem:[#allocation5 + $0x140] sm:$0xff]  ;;  %v822_v58 = vld [vmem:[#allocation5 + $0x150] sm:$0xff]  ;;  %v596_v18 = vpack.c.bf16 %v814_v50, %v812_v49  ;;  %v534_v19 = vpack.c.bf16 %v818_v52, %v816_v51 }
  0x54   :  { %521 = vmatpush1.bf16.msra.mxu1 %v520_v22  ;;  %v824_v60 = vld [vmem:[#allocation2 + $0x140] sm:$0xff]  ;;  %v826_v61 = vld [vmem:[#allocation2 + $0x150] sm:$0xff]  ;;  %v828_v62 = vld [vmem:[#allocation5 + $0x168] sm:$0xff] }
  0x55   :  { %585 = vmatpush1.bf16.msra.mxu0 %v584_v23  ;;  %523 = vmatprep.subr.bf16.mxu1 %v522_v24  ;;  %v830_v63 = vld [vmem:[#allocation5 + $0x178] sm:$0xff]  ;;  %v832_v0 = vld [vmem:[#allocation2 + $0x168] sm:$0xff]  ;;  %v836_v2 = vld [vmem:[#allocation5 + $0x160] sm:$0xff]  ;;  %v598_v23 = vpack.c.bf16 %v99_v56, %v97_v55  ;;  %v536_v24 = vpack.c.bf16 %v822_v58, %v820_v57 }
  0x56   :  { %587 = vmatprep.subr.bf16.mxu0 %v586_v28  ;;  %v834_v1 = vld [vmem:[#allocation2 + $0x178] sm:$0xff]  ;;  %v838_v3 = vld [vmem:[#allocation5 + $0x170] sm:$0xff]  ;;  %v840_v4 = vld [vmem:[#allocation2 + $0x160] sm:$0xff]  ;;  %v600_v28 = vpack.c.bf16 %v826_v61, %v824_v60  ;;  %v538_v29 = vpack.c.bf16 %v830_v63, %v828_v62 }
  0x57   :  { %v842_v5 = vld [vmem:[#allocation2 + $0x170] sm:$0xff]  ;;  %v844_v6 = vld [vmem:[#allocation5 + $0x188] sm:$0xff]  ;;  %v846_v7 = vld [vmem:[#allocation5 + $0x198] sm:$0xff]  ;;  %v602_v30 = vpack.c.bf16 %v834_v1, %v832_v0  ;;  %v540_v31 = vpack.c.bf16 %v838_v3, %v836_v2 }
  0x58   :  { %525 = vmatpush1.bf16.msra.mxu1 %v524_v34  ;;  %v848_v8 = vld [vmem:[#allocation2 + $0x188] sm:$0xff]  ;;  %v850_v9 = vld [vmem:[#allocation2 + $0x198] sm:$0xff]  ;;  %v852_v10 = vld [vmem:[#allocation5 + $0x180] sm:$0xff]  ;;  %v604_v35 = vpack.c.bf16 %v842_v5, %v840_v4 }
  0x59   :  { %589 = vmatpush1.bf16.msra.mxu0 %v588_v36  ;;  %527 = vmatprep.subr.bf16.mxu1 %v526_v37  ;;  %v854_v11 = vld [vmem:[#allocation5 + $0x190] sm:$0xff]  ;;  %v856_v13 = vld [vmem:[#allocation2 + $0x180] sm:$0xff]  ;;  %v860_v15 = vld [vmem:[#allocation5 + $0x1a8] sm:$0xff]  ;;  %v542_v36 = vpack.c.bf16 %v846_v7, %v844_v6  ;;  %v606_v37 = vpack.c.bf16 %v850_v9, %v848_v8 }
  0x5a   :  { %591 = vmatprep.subr.bf16.mxu0 %v590_v41  ;;  %v858_v14 = vld [vmem:[#allocation2 + $0x190] sm:$0xff]  ;;  %v862_v16 = vld [vmem:[#allocation5 + $0x1b8] sm:$0xff]  ;;  %v864_v17 = vld [vmem:[#allocation2 + $0x1a8] sm:$0xff]  ;;  %v544_v38 = vpack.c.bf16 %v854_v11, %v852_v10 }
  0x5b   :  { %v870_v20 = vld [vmem:[#allocation2 + $0x1b8] sm:$0xff]  ;;  %v872_v21 = vld [vmem:[#allocation5 + $0x1a0] sm:$0xff]  ;;  %v874_v22 = vld [vmem:[#allocation5 + $0x1b0] sm:$0xff]  ;;  %v608_v41 = vpack.c.bf16 %v858_v14, %v856_v13  ;;  %v546_v42 = vpack.c.bf16 %v862_v16, %v860_v15 }
  0x5c   :  { %529 = vmatpush1.bf16.msra.mxu1 %v528_v48  ;;  %v878_v25 = vld [vmem:[#allocation2 + $0x1a0] sm:$0xff]  ;;  %v880_v26 = vld [vmem:[#allocation2 + $0x1b0] sm:$0xff]  ;;  %v882_v27 = vld [vmem:[#allocation5 + $0x1c8] sm:$0xff]  ;;  %v610_v43 = vpack.c.bf16 %v870_v20, %v864_v17  ;;  %v548_v44 = vpack.c.bf16 %v874_v22, %v872_v21 }
  0x5d   :  { %593 = vmatpush1.bf16.msra.mxu0 %v592_v53  ;;  %531 = vmatprep.subr.bf16.mxu1 %v530_v54  ;;  %v892_v32 = vld [vmem:[#allocation5 + $0x1d8] sm:$0xff]  ;;  %v894_v33 = vld [vmem:[#allocation2 + $0x1c8] sm:$0xff]  ;;  %v906_v39 = vld [vmem:[#allocation5 + $0x1c0] sm:$0xff]  ;;  %v612_v45 = vpack.c.bf16 %v880_v26, %v878_v25 }
  0x5e   :  { %595 = vmatprep.subr.bf16.mxu0 %v594_v59  ;;  %v896_v34 = vld [vmem:[#allocation2 + $0x1d8] sm:$0xff]  ;;  %v908_v40 = vld [vmem:[#allocation5 + $0x1d0] sm:$0xff]  ;;  %v550_v46 = vpack.c.bf16 %v892_v32, %v882_v27  ;;  %v924_v48 = vld [vmem:[#allocation7] sm:$0xff] }
  0x5f   :  { %v614_v47 = vpack.c.bf16 %v896_v34, %v894_v33  ;;  %v552_v49 = vpack.c.bf16 %v908_v40, %v906_v39  ;;  %v928_v50 = vld [vmem:[#allocation7 + $0x8] sm:$0xff]  ;;  %v188_v51 = vcombine.high %v924_v48, %v924_v48  ;;  %v226_v52 = vsel %vm192_vm0, %v924_v48, -inf  ;;  %v112_v14 = vld [vmem:[#allocation2 + $0x1c0] sm:$0xff]  ;;  %v114_v15 = vld [vmem:[#allocation2 + $0x1d0] sm:$0xff] }
  0x60   :  { %533 = vmatpush1.bf16.msra.mxu1 %v532_v12  ;;  %v193_v53 = vsel %vm192_vm0, %v924_v48, 0.0  ;;  %v189_v54 = vcombine.high %v928_v50, %v928_v50  ;;  %v227_v55 = vrot.slane %v226_v52, 4  ;;  %v240_v56 = vsel %vm192_vm0, %v928_v50, -inf  ;;  %v180_v17 = vld [vmem:[#allocation5 + $0x1e0] sm:$0xff]  ;;  %v182_v20 = vld [vmem:[#allocation5 + $0x1f0] sm:$0xff] }
  0x61   :  { %597 = vmatpush1.bf16.msra.mxu0 %v596_v18  ;;  %535 = vmatprep.subr.bf16.mxu1 %v534_v19  ;;  %v194_v57 = vrot.slane %v193_v53, 4  ;;  %v233_v58 = vsel %vm192_vm0, %v188_v51, -inf  ;;  %v200_v59 = vsel %vm192_vm0, %v188_v51, 0.0  ;;  %v241_v60 = vrot.slane %v240_v56, 4  ;;  %v183_v51 = vld [vmem:[#allocation5 + $0x1f8] sm:$0xff]  ;;  %v116_v22 = vld [vmem:[#allocation2 + $0x1e0] sm:$0xff] }
  0x62   :  { %599 = vmatprep.subr.bf16.mxu0 %v598_v23  ;;  %v207_v61 = vsel %vm192_vm0, %v928_v50, 0.0  ;;  %v234_v62 = vrot.slane %v233_v58, 4  ;;  %v247_v63 = vsel %vm192_vm0, %v189_v54, -inf  ;;  %v201_v0 = vrot.slane %v200_v59, 4 }
  0x63   :  { %v214_v1 = vsel %vm192_vm0, %v189_v54, 0.0  ;;  %v248_v2 = vrot.slane %v247_v63, 4  ;;  %v228_v4 = vmax.f32 %v226_v52, %v227_v55  ;;  %v242_v5 = vmax.f32 %v240_v56, %v241_v60  ;;  %v117_v60 = vld [vmem:[#allocation2 + $0x1e8] sm:$0xff] }
  0x64   :  { %537 = vmatpush1.bf16.msra.mxu1 %v536_v24  ;;  %v215_v3 = vrot.slane %v214_v1, 4  ;;  %v235_v6 = vmax.f32 %v233_v58, %v234_v62  ;;  %v202_v7 = vadd.f32 %v201_v0, %v200_v59  ;;  %v195_v8 = vadd.f32 %v194_v57, %v193_v53 }
  0x65   :  { %601 = vmatpush1.bf16.msra.mxu0 %v600_v28  ;;  %539 = vmatprep.subr.bf16.mxu1 %v538_v29  ;;  %v208_v9 = vrot.slane %v207_v61, 4  ;;  %v249_v10 = vmax.f32 %v247_v63, %v248_v2  ;;  %v229_v12 = vrot.slane %v228_v4, 2  ;;  %v243_v13 = vrot.slane %v242_v5, 2 }
  0x66   :  { %603 = vmatprep.subr.bf16.mxu0 %v602_v30  ;;  %v216_v11 = vadd.f32 %v215_v3, %v214_v1  ;;  %v236_v16 = vrot.slane %v235_v6, 2  ;;  %v203_v18 = vrot.slane %v202_v7, 2  ;;  %v196_v19 = vrot.slane %v195_v8, 2 }
  0x67   :  { %v209_v23 = vadd.f32 %v208_v9, %v207_v61  ;;  %v250_v24 = vrot.slane %v249_v10, 2  ;;  %v230_v29 = vmax.f32 %v228_v4, %v229_v12  ;;  %v244_v30 = vmax.f32 %v242_v5, %v243_v13  ;;  %v119_v61 = vld [vmem:[#allocation2 + $0x1f8] sm:$0xff] }
  0x68   :  { %541 = vmatpush1.bf16.msra.mxu1 %v540_v31  ;;  %v217_v28 = vrot.slane %v216_v11, 2  ;;  %v181_v31 = vld [vmem:[#allocation5 + $0x1e8] sm:$0xff]  ;;  %v197_v52 = vadd.f32 %v196_v19, %v195_v8  ;;  %v618_v21 = vpack.c.bf16 %v119_v61, %v117_v60  ;;  %v556_v27 = vpack.c.bf16 %v182_v20, %v180_v17 }
  0x69   :  { %605 = vmatpush1.bf16.msra.mxu0 %v604_v35  ;;  %543 = vmatprep.subr.bf16.mxu1 %v542_v36  ;;  %v237_v35 = vmax.f32 %v235_v6, %v236_v16  ;;  %v204_v36 = vadd.f32 %v203_v18, %v202_v7  ;;  %v210_v53 = vrot.slane %v209_v23, 2  ;;  %v251_v54 = vmax.f32 %v249_v10, %v250_v24 }
  0x6a   :  { %607 = vmatprep.subr.bf16.mxu0 %v606_v37  ;;  %v616_v37 = vpack.c.bf16 %v114_v15, %v112_v14  ;;  %v218_v55 = vadd.f32 %v217_v28, %v216_v11  ;;  %v198_v58 = vrot.slane %v197_v52, 1  ;;  %v554_v59 = vpack.c.bf16 %v183_v51, %v181_v31 }
  0x6b   :  { %v238_v56 = vrot.slane %v237_v35, 1  ;;  %v205_v57 = vrot.slane %v204_v36, 1  ;;  %v252_v62 = vrot.slane %v251_v54, 1  ;;  %v231_v0 = vrot.slane %v230_v29, 1 }
  0x6c   :  { %545 = vmatpush1.bf16.msra.mxu1 %v544_v38  ;;  %v211_v38 = vadd.f32 %v210_v53, %v209_v23  ;;  %v219_v63 = vrot.slane %v218_v55, 1  ;;  %v245_v1 = vrot.slane %v244_v30, 1  ;;  %v199_v4 = vadd.f32 %v198_v58, %v197_v52 }
  0x6d   :  { %609 = vmatpush1.bf16.msra.mxu0 %v608_v41  ;;  %547 = vmatprep.subr.bf16.mxu1 %v546_v42  ;;  %v239_v41 = vmax.f32 %v237_v35, %v238_v56  ;;  %v206_v42 = vadd.f32 %v205_v57, %v204_v36  ;;  %v232_v32 = vmax.f32 %v230_v29, %v231_v0  ;;  %v744_v19 = vmov 1966171168  }
  0x6e   :  { %611 = vmatprep.subr.bf16.mxu0 %v610_v43  ;;  %v212_v2 = vrot.slane %v211_v38, 1  ;;  %v253_v43 = vmax.f32 %v251_v54, %v252_v62  ;;  %v220_v3 = vadd.f32 %v219_v63, %v218_v55  ;;  %v429_v23 = vunpack.c.l.s4 %v744_v19 }
  0x6f   :  { %v223_v5 = vmul.f32 0.25, %v206_v42  ;;  %v431_v24 = vlaneseq }
  0x70   :  { %549 = vmatpush1.bf16.msra.mxu1 %v548_v44  ;;  %v118_v44 = vld [vmem:[#allocation2 + $0x1f0] sm:$0xff]  ;;  %v213_v6 = vadd.f32 %v212_v2, %v211_v38  ;;  %v260_v25 = vsel %vm258_vm1, %v253_v43, %v239_v41  ;;  %v225_v26 = vmul.f32 0.25, %v220_v3  ;;  %v430_v28 = vunpack.c.0.s8 %v429_v23 }
  0x71   :  { %613 = vmatpush1.bf16.msra.mxu0 %v612_v45  ;;  %551 = vmatprep.subr.bf16.mxu1 %v550_v46  ;;  %v246_v45 = vmax.f32 %v244_v30, %v245_v1  ;;  %v620_v33 = vpack.c.bf16 %v118_v44, %v116_v22  ;;  %v222_v46 = vmul.f32 0.25, %v199_v4  ;;  %v432_v29 = vshrl.u32 %v431_v24, 7 }
  0x72   :  { %615 = vmatprep.subr.bf16.mxu0 %v614_v47  ;;  %327 = vmatprep.mubr.f32.mxu1 %v260_v25  ;;  %v339_v34 = vsel %vm258_vm1, %v225_v26, %v223_v5  ;;  %v224_v47 = vmul.f32 0.25, %v213_v6 }
  0x73   :  { %406 = vmatprep.mubr.f32.mxu0 %v339_v34  ;;  %v259_v7 = vsel %vm258_vm1, %v246_v45, %v232_v32  ;;  %v433_v31 = vsub.s32 %v430_v28, %v432_v29  ;;  %v452_v52 = vsub.s32 0, %v432_v29  ;;  %v456_v53 = vsub.s32 1, %v432_v29 }
  0x74   :  { %553 = vmatpush1.bf16.msra.mxu1 %v552_v49  ;;  %v338_v39 = vsel %vm258_vm1, %v224_v47, %v222_v46 }
  0x75   :  { %617 = vmatpush1.bf16.msra.mxu0 %v616_v37  ;;  %555 = vmatprep.subr.bf16.mxu1 %v554_v59 }
  0x76   :  { %619 = vmatprep.subr.bf16.mxu0 %v618_v21 }
  0x78   :  { %557 = vmatpush1.bf16.msra.mxu1 %v556_v27 }
  0x79   :  { %621 = vmatpush1.bf16.msra.mxu0 %v620_v33 }
  0x7b   :  { %328 = vmatmul.mubr.f32.vlgmr.msra.gmra.mrb[0].mxu1 %v259_v7 }
  0x7c   :  { %407 = vmatmul.mubr.f32.vlgmr.msra.gmra.mrb[0].mxu0 %v338_v39 }
 0x14e   :  { %v329_v40 = vpop.f32.mrb[0].mxu1 }
 0x14f   :  { %v408_v49 = vpop.f32.mrb[0].mxu0  ;;  %v331_v8 = vpop.f32.mrb[1].mxu1 }
 0x150   :  { %v409_v9 = vadd.f32 %v408_v49, %v329_v40  ;;  %v410_v10 = vpop.f32.mrb[1].mxu0 }
 0x151   :  { %v411_v11 = vadd.f32 %v410_v10, %v331_v8 }
 0x152   :  { %v492_v12 = vmul.f32 -1.442695, %v409_v9 }
 0x153   :  { %v493_v13 = vmul.f32 -1.442695, %v411_v11 }
 0x154   :  { %635 = vpow2.f32 %v492_v12 }
 0x155   :  { %637 = vpow2.f32 %v493_v13 }
 0x15e   :  { %v636_v14 = vpop.eup %635 }
 0x15f   :  { %v638_v15 = vpop.eup %637  ;;  %v419_v16 = vadd.f32 1.0, %v636_v14 }
 0x160   :  { %v420_v18 = vadd.f32 1.0, %v638_v15 }
 0x161   :  { %639 = vrcp.f32 %v419_v16 }
 0x162   :  { %641 = vrcp.f32 %v420_v18 }
 0x16b   :  { %v640_v30 = vpop.eup %639 }
 0x16c   :  { %v642_v51 = vpop.eup %641 }
 0x16d   :  { %v427_v35 = vcombine.low %v640_v30, %v642_v51 }
 0x16f   :  { %v434_v36 = vrot.slane %v427_v35, %v433_v31 }
 0x171   :  { %v435_v37 = vcombine.high %v434_v36, %v434_v36  ;;  %v442_v54 = vrot.slane %v434_v36, %v433_v31 }
 0x173   :  { %v449_v55 = vrot.slane %v435_v37, %v433_v31  ;;  %v453_v56 = vrot.slane %v442_v54, %v452_v52  ;;  %v457_v57 = vrot.slane %v442_v54, %v456_v53 }
 0x175   :  { %v461_v58 = vrot.slane %v449_v55, %v452_v52  ;;  %v465_v38 = vrot.slane %v449_v55, %v456_v53  ;;  %v466_v59 = vcombine.low %v453_v56, %v457_v57 }
 0x177   :  { %v467_v60 = vcombine.low %v461_v58, %v465_v38  ;;  %v470_v61 = vmul.f32 %v466_v59, %v924_v48 }
 0x179   :  { %v471_v62 = vmul.f32 %v467_v60, %v928_v50  ;;  %472 = vst [vmem:[#allocation8] sm:$0xff] %v470_v61 }
 0x17b   :  { %473 = vst [vmem:[#allocation8 + $0x8] sm:$0xff] %v471_v62 }
 0x17c   :  { %720 = shalt.err (!%p717_p0)
}
 0x17d   :  { %s721_s27 = scalar_lea.hbm %s988_s3, 256 }
 0x17e   :  { %p722_p1 = scmp.ne.s32.totalorder %s988_s3, %s721_s27  ;;  %p725_p2 = scmp.lt.u32.totalorder %s721_s27, %s988_s3 }
 0x180   :  { %p727_p3 = pnand %p725_p2, %p722_p1 }
 0x182   :  { %730 = shalt.err (!%p727_p3)
}
 0x183   :  { %485 = dma.vmem_to_hbm [thread:$0]  %s480_s23, 256, %s988_s3, [#allocation4], %s742_s0, %s742_s0, %s743_s15  }
 0x184   :  { %735 = dma.done.wait [#allocation4], 256  }
 0x185   :  { %736 = vsyncadd [#allocation4], 4294967040 }
 0x186   :  { %489 = vsyncpa [#allocation3], 1 }
 0x187   :  { %490 = vsyncpa [#allocation6], 1 }
 0x188   :  { %491 = vsyncpa [#allocation4], 1 }

</bundles_post_ra>
